<compile_context>
chip_gen: v5e
topology: v5e:2x2
jax: 0.10.0
libtpu: 0.0.40
codegen_flags: <defaults>
</compile_context>

<pallas_src>
import jax
import jax.numpy as jnp
from jax.experimental import pallas as pl
from jax.experimental.pallas import tpu as pltpu


def _concat_prefix_flat_kernel(prefix_ref, x_ref, out_ref):
    # prefix_ref: (1, P*D)        -- same block every grid step (flattened prefix)
    # x_ref:      (TB, S*D)       -- TB batch rows of flattened tokens
    # out_ref:    (TB, (P+S)*D)   -- flattened output rows
    tb = x_ref.shape[0]
    pd = prefix_ref.shape[1]
    prefix_b = jnp.broadcast_to(prefix_ref[...], (tb, pd))
    # Build the whole output block in VMEM and do a single unmasked store.
    out_ref[...] = jnp.concatenate([prefix_b, x_ref[...]], axis=-1)


def _choose_batch_tile(B, per_row_bytes, target_bytes=2 << 20):
    """Largest batch tile that (a) divides B and (b) keeps the per-step tile
    around `target_bytes` (so double-buffered VMEM stays small everywhere,
    including v7x's 64 MiB)."""
    tb = max(1, min(B, target_bytes // max(per_row_bytes, 1)))
    while B % tb != 0:
        tb -= 1
    return tb


def army_prefix_tuning_forward(x, prefix_embeddings, layer_idx, *, use_pallas=None):
    """Forward pass. x: (B, S, D), prefix_embeddings: (P, D)."""
    if layer_idx != 0:          # identity path (layer_idx must be static under jit)
        return x

    B, S, D = x.shape
    P, D2 = prefix_embeddings.shape
    assert D == D2, f"embed dim mismatch: x has {D}, prefix has {D2}"

    itemsize = jnp.dtype(x.dtype).itemsize
    out_bytes = B * (P + S) * D * itemsize
    if use_pallas is None:
        # Tiny copies: XLA's native concat beats any pallas_call launch overhead.
        use_pallas = out_bytes >= (1 << 20)
    if not use_pallas:
        return jnp.concatenate(
            [jnp.broadcast_to(prefix_embeddings[None].astype(x.dtype), (B, P, D)), x],
            axis=1,
        )

    # Lane-dense flat layout: concat along seq == concat at flat offset P*D.
    PD = P * D
    SD = S * D
    x_flat = x.reshape(B, SD)
    prefix_flat = prefix_embeddings.astype(x.dtype).reshape(1, PD)

    per_row_bytes = (SD + PD + SD) * itemsize          # x row in + out row out
    TB = _choose_batch_tile(B, per_row_bytes)
    grid = (B // TB,)

    bytes_accessed = (B * SD + PD + B * (PD + SD)) * itemsize

    out_flat = pl.pallas_call(
        _concat_prefix_flat_kernel,
        out_shape=jax.ShapeDtypeStruct((B, PD + SD), x.dtype),
        grid_spec=pl.GridSpec(
            grid=grid,
            in_specs=[
                # flattened prefix: one (1, P*D) block reused every grid step
                pl.BlockSpec((1, PD), lambda b: (0, 0)),
                # TB flattened batch rows per grid step
                pl.BlockSpec((TB, SD), lambda b: (b, 0)),
            ],
            out_specs=pl.BlockSpec((TB, PD + SD), lambda b: (b, 0)),
        ),
        compiler_params=pltpu.CompilerParams(
            dimension_semantics=("parallel",),
        ),
        cost_estimate=pl.CostEstimate(
            flops=0, transcendentals=0, bytes_accessed=bytes_accessed
        ),
    )(prefix_flat, x_flat)

    return out_flat.reshape(B, P + S, D)


def build_prefix_embeddings(key, vocab_size, embed_dim, prefix_length):
    """Deterministic synthetic stand-in for tokenizer.encode + embedding lookup."""
    # TODO(synk): real module uses tokenizer.encode(personality_text) + the base
    # model's embedding table; that host-side param construction has no Pallas
    # equivalent and is done here with plain-JAX glue.
    k_emb, k_tok = jax.random.split(key)
    embedding_table = jax.random.normal(k_emb, (vocab_size, embed_dim), jnp.float32) * 0.02
    tokens = jax.random.randint(k_tok, (prefix_length,), 0, vocab_size)
    prefix_embeds = embedding_table[tokens]  # (P, D)
    return prefix_embeds


if __name__ == "__main__":
    key = jax.random.PRNGKey(0)
    k_prefix, k_x = jax.random.split(key)

    # Small shapes consistent with the module.
    batch = 2
    seq = 8
    embed_dim = 32
    prefix_length = 8
    vocab_size = 64

    prefix_embeddings = build_prefix_embeddings(
        k_prefix, vocab_size, embed_dim, prefix_length
    )
    x = jax.random.normal(k_x, (batch, seq, embed_dim), jnp.float32)

    # layer_idx == 0: prefix is prepended (force the Pallas path so the kernel runs).
    out0 = army_prefix_tuning_forward(x, prefix_embeddings, layer_idx=0, use_pallas=True)
    out0 = jax.block_until_ready(out0)

    # Reference check in plain JAX.
    ref0 = jnp.concatenate(
        [jnp.broadcast_to(prefix_embeddings[None], (batch, prefix_length, embed_dim)), x],
        axis=1,
    )
    assert out0.shape == (batch, prefix_length + seq, embed_dim)
    assert jnp.allclose(out0, ref0), "prefix-concat mismatch"

    # Auto-dispatch path (tiny input -> plain jnp concat), must match too.
    out_auto = jax.block_until_ready(
        army_prefix_tuning_forward(x, prefix_embeddings, layer_idx=0)
    )
    assert jnp.allclose(out_auto, ref0), "auto-dispatch path mismatch"

    # layer_idx != 0: identity.
    out1 = jax.block_until_ready(
        army_prefix_tuning_forward(x, prefix_embeddings, layer_idx=1)
    )
    assert jnp.allclose(out1, x), "identity path mismatch"

    print("KERNEL_OK")
</pallas_src>

<mosaic_0001>
module attributes {stable_mosaic.version = 11 : i64} {
  func.func @_concat_prefix_flat_kernel(%arg0: i32, %arg1: memref<1x256xf32, #tpu.memory_space<vmem>>, %arg2: memref<2x256xf32, #tpu.memory_space<vmem>>, %arg3: memref<2x512xf32, #tpu.memory_space<vmem>>) attributes {dimension_semantics = [#tpu.dimension_semantics<parallel>], iteration_bounds = array<i64: 1>, scalar_prefetch = 0 : i64, scratch_operands = 0 : i64, tpu.core_type = #tpu.core_type<tc>, window_params = [{pipeline_mode = #tpu.pipeline_mode<synchronous>, transform_indices = @transform_0, window_bounds = array<i64: 1, 256>}, {transform_indices = @transform_1, window_bounds = array<i64: 2, 256>}, {transform_indices = @transform_2, window_bounds = array<i64: 2, 512>}]} {
    %c0 = arith.constant 0 : index
    %c0_0 = arith.constant 0 : index
    %0 = vector.load %arg1[%c0, %c0_0] : memref<1x256xf32, #tpu.memory_space<vmem>>, vector<1x256xf32>
    %1 = vector.shape_cast %0 : vector<1x256xf32> to vector<1x256xf32>
    %2 = vector.broadcast %1 : vector<1x256xf32> to vector<2x256xf32>
    %c0_1 = arith.constant 0 : index
    %c0_2 = arith.constant 0 : index
    %3 = vector.load %arg2[%c0_1, %c0_2] : memref<2x256xf32, #tpu.memory_space<vmem>>, vector<2x256xf32>
    %4 = tpu.concatenate %2, %3 in 1 : vector<2x256xf32>, vector<2x256xf32> -> vector<2x512xf32>
    %c0_3 = arith.constant 0 : index
    %c0_4 = arith.constant 0 : index
    %5 = vector.load %arg3[%c0_3, %c0_4] : memref<2x512xf32, #tpu.memory_space<vmem>>, vector<2x512xf32>
    tpu.vector_store %arg3[%c0_3, %c0_4], %4 {strides = array<i32>} : memref<2x512xf32, #tpu.memory_space<vmem>>, vector<2x512xf32>,
    return
  }
  func.func @transform_0(%arg0: i32) -> (i32, i32) {
    %c0_i32 = arith.constant 0 : i32
    %c0_i32_0 = arith.constant 0 : i32
    %c0_i32_1 = arith.constant 0 : i32
    return %c0_i32, %c0_i32_0 : i32, i32
  }
  func.func @transform_1(%arg0: i32) -> (i32, i32) {
    %c0_i32 = arith.constant 0 : i32
    %c0_i32_0 = arith.constant 0 : i32
    return %arg0, %c0_i32 : i32, i32
  }
  func.func @transform_2(%arg0: i32) -> (i32, i32) {
    %c0_i32 = arith.constant 0 : i32
    %c0_i32_0 = arith.constant 0 : i32
    return %arg0, %c0_i32 : i32, i32
  }
}

</mosaic_0001>

<bundles_post_ra>
// kernel: tpu_custom_call.1
= control target key start
LH: loop header
LB: loop body
LE: loop exit
PB: predicated region body
PF: predicated region fallthrough
CT: control target
= control target key end

     0   :  { %7 = vsyncpa [#allocation3], 0  ;;  %s186_s0 = inlined_call_operand.hbm [shape: f32[1,256], index: 0, kind: input, shape index: {}]   ;;  %s187_s1 = inlined_call_operand.hbm [shape: f32[2,256], index: 1, kind: input, shape index: {}]   ;;  %s188_s2 = inlined_call_operand.hbm [shape: f32[2,512], index: 2, kind: output, shape index: {}]  }
   0x1   :  { %8 = vsyncpa [#allocation6], 0 }
   0x2   :  { %9 = vsyncpa [#allocation4], 0  ;;  %s15_s11 = sshll.u32 %s186_s0, 4  ;;  %s159_s12 = smov [#allocation2]   ;;  %s16_s11 = int_to_ptr.hbm [resolvable:$true] %s15_s11 }
   0x3   :  { %s17_s13 = sshll.u32 %s159_s12, 4  ;;  %s26_s16 = sshll.u32 %s187_s1, 4  ;;  %s18_s13 = int_to_ptr.vmem [resolvable:$true] %s17_s13  ;;  %s27_s16 = int_to_ptr.hbm [resolvable:$true] %s26_s16 }
   0x4   :  { %20 = dma.hbm_to_vmem [thread:$0]  %s16_s11, 32, %s18_s13, [#allocation3]  }
   0x5   :  { %s160_s17 = smov [#allocation5]  }
   0x6   :  { %s28_s18 = sshll.u32 %s160_s17, 4  ;;  %s29_s18 = int_to_ptr.vmem [resolvable:$true] %s28_s18 }
   0x7   :  { %31 = dma.hbm_to_vmem [thread:$0]  %s27_s16, 64, %s29_s18, [#allocation6]  }
   0x8   :  { %153 = dma.done.wait [#allocation3], 32  }
   0x9   :  { %154 = vsyncadd [#allocation3], 4294967264 }
   0xa   :  { %155 = dma.done.wait [#allocation6], 64  }
   0xb   :  { %156 = vsyncadd [#allocation6], 4294967232  ;;  %v44_v0 = vld [vmem:[#allocation5] sm:$0xf]  ;;  %v40_v1 = vld [vmem:[#allocation2] sm:$0x3] }
   0xc   :  { %46 = vst [vmem:[#allocation1] ss:$4 sm:$0xff] %v44_v0  ;;  %v43_v2 = vperm.slane %v40_v1, 1  ;;  %v42_v3 = vperm.slane %v40_v1, 0  ;;  %vm52_vm0 = vcmask 1041408   ;;  %vm54_vm1 = vcmask 1045508  }
   0xd   :  { %s161_s0 = smov [#allocation7]   ;;  %s67_s21 = sshll.u32 %s188_s2, 4  ;;  %vm56_vm2 = vcmask 1043456   ;;  %s68_s21 = int_to_ptr.hbm [resolvable:$true] %s67_s21 }
   0xe   :  { %v49_v4 = vrot.slane %v43_v2, 6  ;;  %s65_s1 = sshll.u32 %s161_s0, 4  ;;  %s66_s1 = int_to_ptr.vmem [resolvable:$true] %s65_s1 }
  0x10   :  { %v53_v9 = vsel %vm52_vm0, %v42_v3, %v49_v4 }
  0x13   :  { %v47_v5 = vld.sshfl [vmem:[#allocation1] sm:$0xff pattern:$0x73625140]  ;;  %v48_v6 = vld.sshfl [vmem:[#allocation1 + $0x8] sm:$0xff pattern:$0x73625140] }
  0x14   :  { %v50_v7 = vrot.slane %v47_v5, 4  ;;  %v51_v8 = vrot.slane %v48_v6, 2 }
  0x16   :  { %v55_v10 = vsel %vm54_vm1, %v50_v7, %v51_v8 }
  0x17   :  { %v57_v11 = vsel %vm56_vm2, %v53_v9, %v55_v10 }
  0x18   :  { %59 = vst [vmem:[#allocation7] sm:$0xff] %v57_v11 }
  0x19   :  { %70 = dma.vmem_to_hbm [thread:$0]  %s66_s1, 128, %s68_s21, [#allocation4]  }
  0x1a   :  { %157 = dma.done.wait [#allocation4], 128  }
  0x1b   :  { %158 = vsyncadd [#allocation4], 4294967168 }
  0x1c   :  { %75 = vsyncpa [#allocation3], 1 }
  0x1d   :  { %76 = vsyncpa [#allocation6], 1 }
  0x1e   :  { %77 = vsyncpa [#allocation4], 1 }

</bundles_post_ra>
